<compile_context>
chip_gen: v7x
topology: tpu7x:2x2x1
jax: 0.10.0
libtpu: 0.0.40
codegen_flags: <defaults>
</compile_context>

<pallas_src>
import jax
import jax.numpy as jnp
import numpy as np
from jax.experimental import pallas as pl
from jax.experimental.pallas import tpu as pltpu


def _make_miou_stats_kernel(C, T, chunk, HW):
    """Kernel over grid (N, num_spatial_tiles).

    Inputs per step:  logits block (1, C, T) [native dtype], labels (1, 1, T).
    Accumulates lane-dense (C, chunk) partials for inter, sum(p), class counts.
    """
    n_inner = T // chunk

    def kernel(x_ref, t_ref, inter_ref, psum_ref, cnt_ref, iacc, pacc, cacc):
        s = pl.program_id(1)

        @pl.when(s == 0)
        def _():
            iacc[...] = jnp.zeros_like(iacc)
            pacc[...] = jnp.zeros_like(pacc)
            cacc[...] = jnp.zeros_like(cacc)

        class_ids = jax.lax.broadcasted_iota(jnp.int32, (C, chunk), 0)
        lane_ids = jax.lax.broadcasted_iota(jnp.int32, (1, chunk), 1)
        tile_base = s * T

        # Static inner loop over lane chunks: pure VPU adds into lane-dense
        # accumulators, no per-tile cross-lane (XLU) reduction.
        for j in range(n_inner):
            lo, hi = j * chunk, (j + 1) * chunk
            x = x_ref[0, :, lo:hi].astype(jnp.float32)      # (C, chunk)
            t = t_ref[0, :, lo:hi].astype(jnp.int32)        # (1, chunk)

            # mask lanes that fall past the true spatial extent (cdiv grid)
            valid = (tile_base + lo + lane_ids) < HW        # (1, chunk) bool
            x = jnp.where(valid, x, 0.0)

            # softmax over the class (sublane) axis, per pixel
            m = jnp.max(x, axis=0, keepdims=True)           # (1, chunk)
            e = jnp.exp(x - m)
            denom = jnp.sum(e, axis=0, keepdims=True)       # (1, chunk)
            p = e * pl.reciprocal(denom, approx=False)      # (C, chunk)

            # fused one-hot: boolean mask, no float one-hot materialized
            onehot = jnp.logical_and(t == class_ids, valid)  # (C, chunk)

            iacc[...] += jnp.where(onehot, p, 0.0)           # inter partials
            pacc[...] += jnp.where(valid, p, 0.0)            # sum(p) partials
            cacc[...] += onehot.astype(jnp.float32)          # class counts

        @pl.when(s == pl.num_programs(1) - 1)
        def _():
            inter_ref[0] = iacc[...]
            psum_ref[0] = pacc[...]
            cnt_ref[0] = cacc[...]

    return kernel


def weighted_miou_loss(logits, target, *, n_classes, norm=False,
                       upper_bound=1.0, spatial_tile=None, chunk=512,
                       vmem_limit_bytes=32 * 1024 * 1024):
    """JAX/Pallas equivalent of WeightedmIoULoss.forward."""
    N, C, H, W = logits.shape
    assert C == n_classes
    HW = H * W

    # Stream logits in their native dtype (bf16 stays bf16 over HBM);
    # labels as int8 when they fit -> 4x less label traffic.
    x = logits.reshape(N, C, HW)
    label_dtype = jnp.int8 if n_classes <= 127 else jnp.int32
    t = target.reshape(N, 1, HW).astype(label_dtype)

    # ---- tile-size selection (T = spatial tile, chunk = accumulator width) --
    if HW < 128:
        chunk_eff = HW
        T = HW
    else:
        chunk_eff = max(128, (min(chunk, HW) // 128) * 128)
        if spatial_tile is None:
            bytes_per_pixel = C * x.dtype.itemsize + t.dtype.itemsize
            # keep double-buffered input blocks well inside scoped VMEM
            t_cap = (8 * 1024 * 1024) // max(1, 2 * bytes_per_pixel)
            desired = max(chunk_eff, min(16384, int(t_cap)))
        else:
            desired = spatial_tile
        T = max(chunk_eff, (min(desired, HW) // chunk_eff) * chunk_eff)

    n_spatial = pl.cdiv(HW, T)
    grid = (N, n_spatial)

    out_sds = jax.ShapeDtypeStruct((N, C, chunk_eff), jnp.float32)
    kernel = _make_miou_stats_kernel(C, T, chunk_eff, HW)

    inter_p, psum_p, cnt_p = pl.pallas_call(
        kernel,
        out_shape=(out_sds, out_sds, out_sds),
        grid_spec=pltpu.PrefetchScalarGridSpec(
            num_scalar_prefetch=0,
            grid=grid,
            in_specs=[
                pl.BlockSpec((1, C, T), lambda n, s: (n, 0, s)),
                pl.BlockSpec((1, 1, T), lambda n, s: (n, 0, s)),
            ],
            out_specs=[
                pl.BlockSpec((1, C, chunk_eff), lambda n, s: (n, 0, 0)),
                pl.BlockSpec((1, C, chunk_eff), lambda n, s: (n, 0, 0)),
                pl.BlockSpec((1, C, chunk_eff), lambda n, s: (n, 0, 0)),
            ],
            scratch_shapes=[pltpu.VMEM((C, chunk_eff), jnp.float32)
                            for _ in range(3)],
        ),
        compiler_params=pltpu.CompilerParams(
            dimension_semantics=("parallel", "arbitrary"),
            vmem_limit_bytes=vmem_limit_bytes),
    )(x, t)

    # ---- tiny (N, C) epilogue in plain JAX ----------------------------------
    inter = inter_p.sum(axis=-1)                    # (N, C)
    psum = psum_p.sum(axis=-1)                      # (N, C)
    counts = cnt_p.sum(axis=-1)                     # (N, C)
    union = psum + counts - inter                   # (N, C)

    # np.histogram(target, range(C+1), normed=True) == per-class frequency
    hist = counts.sum(axis=0) / float(N * HW)       # (C,)
    nonzero = hist > 0
    if norm:
        weights = jnp.where(
            nonzero, upper_bound / jnp.where(nonzero, hist, 1.0), 0.0) + 1.0
    else:
        weights = nonzero.astype(jnp.float32) * upper_bound * (1.0 - hist) + 1.0

    loss = weights[None, :] * inter / (weights[None, :] * union + 1e-8)
    return -jnp.mean(loss)


def _reference_loss(logits, target, n_classes, upper_bound=1.0):
    """Pure-JAX reference (mirrors the PyTorch module, norm=False)."""
    N, C, H, W = logits.shape
    p = jax.nn.softmax(logits.astype(jnp.float32), axis=1)
    onehot = jax.nn.one_hot(target, n_classes, axis=1, dtype=jnp.float32)
    inter = (p * onehot).reshape(N, C, -1).sum(-1)
    union = (p + onehot - p * onehot).reshape(N, C, -1).sum(-1)
    hist = onehot.sum(axis=(0, 2, 3)) / float(N * H * W)
    weights = (hist != 0).astype(jnp.float32) * upper_bound * (1.0 - hist) + 1.0
    loss = weights[None, :] * inter / (weights[None, :] * union + 1e-8)
    return -jnp.mean(loss)


if __name__ == "__main__":
    n_classes = 4
    N, C, H, W = 2, n_classes, 16, 16

    key = jax.random.PRNGKey(0)
    k_logits, k_target = jax.random.split(key)
    logits = jax.random.normal(k_logits, (N, C, H, W), dtype=jnp.float32)
    target = jax.random.randint(k_target, (N, H, W), 0, n_classes, dtype=jnp.int32)

    out = weighted_miou_loss(logits, target, n_classes=n_classes)
    out = jax.block_until_ready(out)

    ref = jax.block_until_ready(_reference_loss(logits, target, n_classes))
    assert np.isfinite(float(out))
    assert np.allclose(np.asarray(out), np.asarray(ref), rtol=1e-5, atol=1e-5), (
        f"pallas={float(out)} ref={float(ref)}")

    print("KERNEL_OK")
</pallas_src>

<mosaic_0001>
module attributes {stable_mosaic.version = 11 : i64} {
  func.func @kernel(%arg0: i32, %arg1: i32, %arg2: memref<1x4x256xf32, #tpu.memory_space<vmem>>, %arg3: memref<1x1x256xi8, #tpu.memory_space<vmem>>, %arg4: memref<1x4x256xf32, #tpu.memory_space<vmem>>, %arg5: memref<1x4x256xf32, #tpu.memory_space<vmem>>, %arg6: memref<1x4x256xf32, #tpu.memory_space<vmem>>, %arg7: memref<4x256xf32, #tpu.memory_space<vmem>>, %arg8: memref<4x256xf32, #tpu.memory_space<vmem>>, %arg9: memref<4x256xf32, #tpu.memory_space<vmem>>) attributes {dimension_semantics = [#tpu.dimension_semantics<parallel>, #tpu.dimension_semantics<arbitrary>], iteration_bounds = array<i64: 2, 1>, scalar_prefetch = 0 : i64, scratch_operands = 3 : i64, tpu.core_type = #tpu.core_type<tc>, window_params = [{transform_indices = @transform_0, window_bounds = array<i64: 1, 4, 256>}, {transform_indices = @transform_1, window_bounds = array<i64: 1, 1, 256>}, {transform_indices = @transform_2, window_bounds = array<i64: 1, 4, 256>}, {transform_indices = @transform_3, window_bounds = array<i64: 1, 4, 256>}, {transform_indices = @transform_4, window_bounds = array<i64: 1, 4, 256>}]} {
    %c0_i32 = arith.constant 0 : i32
    %0 = arith.cmpi eq, %arg1, %c0_i32 : i32
    %1 = arith.extui %0 : i1 to i32
    %c0_i32_0 = arith.constant 0 : i32
    %2 = arith.cmpi ne, %1, %c0_i32_0 : i32
    scf.if %2 {
      %cst_26 = arith.constant 0.000000e+00 : f32
      %54 = vector.broadcast %cst_26 : f32 to vector<4x256xf32>
      %c0_27 = arith.constant 0 : index
      %c0_28 = arith.constant 0 : index
      %55 = vector.load %arg7[%c0_27, %c0_28] : memref<4x256xf32, #tpu.memory_space<vmem>>, vector<4x256xf32>
      tpu.vector_store %arg7[%c0_27, %c0_28], %54 {strides = array<i32>} : memref<4x256xf32, #tpu.memory_space<vmem>>, vector<4x256xf32>,
      %cst_29 = arith.constant 0.000000e+00 : f32
      %56 = vector.broadcast %cst_29 : f32 to vector<4x256xf32>
      %c0_30 = arith.constant 0 : index
      %c0_31 = arith.constant 0 : index
      %57 = vector.load %arg8[%c0_30, %c0_31] : memref<4x256xf32, #tpu.memory_space<vmem>>, vector<4x256xf32>
      tpu.vector_store %arg8[%c0_30, %c0_31], %56 {strides = array<i32>} : memref<4x256xf32, #tpu.memory_space<vmem>>, vector<4x256xf32>,
      %cst_32 = arith.constant 0.000000e+00 : f32
      %58 = vector.broadcast %cst_32 : f32 to vector<4x256xf32>
      %c0_33 = arith.constant 0 : index
      %c0_34 = arith.constant 0 : index
      %59 = vector.load %arg9[%c0_33, %c0_34] : memref<4x256xf32, #tpu.memory_space<vmem>>, vector<4x256xf32>
      tpu.vector_store %arg9[%c0_33, %c0_34], %58 {strides = array<i32>} : memref<4x256xf32, #tpu.memory_space<vmem>>, vector<4x256xf32>,
    } else {
    }
    %3 = tpu.iota {dimensions = array<i32: 0>} : vector<4x256xi32>
    %4 = tpu.iota {dimensions = array<i32: 1>} : vector<1x256xi32>
    %c256_i32 = arith.constant 256 : i32
    %5 = arith.muli %arg1, %c256_i32 : i32
    %c0 = arith.constant 0 : index
    %c0_1 = arith.constant 0 : index
    %c0_2 = arith.constant 0 : index
    %6 = vector.load %arg2[%c0, %c0_1, %c0_2] : memref<1x4x256xf32, #tpu.memory_space<vmem>>, vector<1x4x256xf32>
    %7 = vector.shape_cast %6 : vector<1x4x256xf32> to vector<4x256xf32>
    %c0_3 = arith.constant 0 : index
    %c0_4 = arith.constant 0 : index
    %c0_5 = arith.constant 0 : index
    %8 = vector.load %arg3[%c0_3, %c0_4, %c0_5] : memref<1x1x256xi8, #tpu.memory_space<vmem>>, vector<1x1x256xi8>
    %9 = vector.shape_cast %8 : vector<1x1x256xi8> to vector<1x256xi8>
    %10 = arith.extsi %9 : vector<1x256xi8> to vector<1x256xi32>
    %c0_i32_6 = arith.constant 0 : i32
    %11 = arith.addi %5, %c0_i32_6 : i32
    %12 = vector.broadcast %11 : i32 to vector<1x256xi32>
    %13 = arith.addi %12, %4 : vector<1x256xi32>
    %c256_i32_7 = arith.constant 256 : i32
    %14 = vector.broadcast %c256_i32_7 : i32 to vector<1x256xi32>
    %15 = arith.cmpi slt, %13, %14 : vector<1x256xi32>
    %cst = arith.constant 0.000000e+00 : f32
    %16 = vector.shape_cast %15 : vector<1x256xi1> to vector<1x256xi1>
    %17 = vector.broadcast %16 : vector<1x256xi1> to vector<4x256xi1>
    %18 = vector.broadcast %cst : f32 to vector<4x256xf32>
    %19 = arith.select %17, %7, %18 : vector<4x256xi1>, vector<4x256xf32>
    %cst_8 = arith.constant dense<0xFF800000> : vector<256xf32>
    %20 = vector.multi_reduction <maximumf>, %19, %cst_8 [0] : vector<4x256xf32> to vector<256xf32>
    %21 = vector.shape_cast %20 : vector<256xf32> to vector<1x256xf32>
    %22 = vector.broadcast %21 : vector<1x256xf32> to vector<4x256xf32>
    %23 = arith.subf %19, %22 : vector<4x256xf32>
    %24 = math.exp %23 : vector<4x256xf32>
    %cst_9 = arith.constant dense<0.000000e+00> : vector<256xf32>
    %25 = vector.multi_reduction <add>, %24, %cst_9 [0] : vector<4x256xf32> to vector<256xf32>
    %26 = vector.shape_cast %25 : vector<256xf32> to vector<1x256xf32>
    %27 = tpu.reciprocal %26 : vector<1x256xf32> -> vector<1x256xf32>
    %28 = vector.broadcast %27 : vector<1x256xf32> to vector<4x256xf32>
    %29 = arith.mulf %24, %28 : vector<4x256xf32>
    %30 = vector.broadcast %10 : vector<1x256xi32> to vector<4x256xi32>
    %31 = arith.cmpi eq, %30, %3 : vector<4x256xi32>
    %32 = vector.broadcast %15 : vector<1x256xi1> to vector<4x256xi1>
    %33 = arith.andi %31, %32 : vector<4x256xi1>
    %c0_10 = arith.constant 0 : index
    %c0_11 = arith.constant 0 : index
    %34 = vector.load %arg7[%c0_10, %c0_11] : memref<4x256xf32, #tpu.memory_space<vmem>>, vector<4x256xf32>
    %cst_12 = arith.constant 0.000000e+00 : f32
    %35 = vector.broadcast %cst_12 : f32 to vector<4x256xf32>
    %36 = arith.select %33, %29, %35 : vector<4x256xi1>, vector<4x256xf32>
    %37 = arith.addf %34, %36 : vector<4x256xf32>
    %c0_13 = arith.constant 0 : index
    %c0_14 = arith.constant 0 : index
    %38 = vector.load %arg7[%c0_13, %c0_14] : memref<4x256xf32, #tpu.memory_space<vmem>>, vector<4x256xf32>
    tpu.vector_store %arg7[%c0_13, %c0_14], %37 {strides = array<i32>} : memref<4x256xf32, #tpu.memory_space<vmem>>, vector<4x256xf32>,
    %c0_15 = arith.constant 0 : index
    %c0_16 = arith.constant 0 : index
    %39 = vector.load %arg8[%c0_15, %c0_16] : memref<4x256xf32, #tpu.memory_space<vmem>>, vector<4x256xf32>
    %cst_17 = arith.constant 0.000000e+00 : f32
    %40 = vector.shape_cast %15 : vector<1x256xi1> to vector<1x256xi1>
    %41 = vector.broadcast %40 : vector<1x256xi1> to vector<4x256xi1>
    %42 = vector.broadcast %cst_17 : f32 to vector<4x256xf32>
    %43 = arith.select %41, %29, %42 : vector<4x256xi1>, vector<4x256xf32>
    %44 = arith.addf %39, %43 : vector<4x256xf32>
    %c0_18 = arith.constant 0 : index
    %c0_19 = arith.constant 0 : index
    %45 = vector.load %arg8[%c0_18, %c0_19] : memref<4x256xf32, #tpu.memory_space<vmem>>, vector<4x256xf32>
    tpu.vector_store %arg8[%c0_18, %c0_19], %44 {strides = array<i32>} : memref<4x256xf32, #tpu.memory_space<vmem>>, vector<4x256xf32>,
    %c0_20 = arith.constant 0 : index
    %c0_21 = arith.constant 0 : index
    %46 = vector.load %arg9[%c0_20, %c0_21] : memref<4x256xf32, #tpu.memory_space<vmem>>, vector<4x256xf32>
    %47 = arith.extui %33 : vector<4x256xi1> to vector<4x256xi32>
    %48 = arith.sitofp %47 : vector<4x256xi32> to vector<4x256xf32>
    %49 = arith.addf %46, %48 : vector<4x256xf32>
    %c0_22 = arith.constant 0 : index
    %c0_23 = arith.constant 0 : index
    %50 = vector.load %arg9[%c0_22, %c0_23] : memref<4x256xf32, #tpu.memory_space<vmem>>, vector<4x256xf32>
    tpu.vector_store %arg9[%c0_22, %c0_23], %49 {strides = array<i32>} : memref<4x256xf32, #tpu.memory_space<vmem>>, vector<4x256xf32>,
    %c0_i32_24 = arith.constant 0 : i32
    %51 = arith.cmpi eq, %arg1, %c0_i32_24 : i32
    %52 = arith.extui %51 : i1 to i32
    %c0_i32_25 = arith.constant 0 : i32
    %53 = arith.cmpi ne, %52, %c0_i32_25 : i32
    scf.if %53 {
      %c0_26 = arith.constant 0 : index
      %c0_27 = arith.constant 0 : index
      %54 = vector.load %arg7[%c0_26, %c0_27] : memref<4x256xf32, #tpu.memory_space<vmem>>, vector<4x256xf32>
      %c0_28 = arith.constant 0 : index
      %c0_29 = arith.constant 0 : index
      %c0_30 = arith.constant 0 : index
      %55 = vector.load %arg4[%c0_28, %c0_29, %c0_30] : memref<1x4x256xf32, #tpu.memory_space<vmem>>, vector<1x4x256xf32>
      %56 = vector.shape_cast %55 : vector<1x4x256xf32> to vector<4x256xf32>
      %57 = vector.shape_cast %54 : vector<4x256xf32> to vector<1x4x256xf32>
      tpu.vector_store %arg4[%c0_28, %c0_29, %c0_30], %57 {strides = array<i32>} : memref<1x4x256xf32, #tpu.memory_space<vmem>>, vector<1x4x256xf32>,
      %c0_31 = arith.constant 0 : index
      %c0_32 = arith.constant 0 : index
      %58 = vector.load %arg8[%c0_31, %c0_32] : memref<4x256xf32, #tpu.memory_space<vmem>>, vector<4x256xf32>
      %c0_33 = arith.constant 0 : index
      %c0_34 = arith.constant 0 : index
      %c0_35 = arith.constant 0 : index
      %59 = vector.load %arg5[%c0_33, %c0_34, %c0_35] : memref<1x4x256xf32, #tpu.memory_space<vmem>>, vector<1x4x256xf32>
      %60 = vector.shape_cast %59 : vector<1x4x256xf32> to vector<4x256xf32>
      %61 = vector.shape_cast %58 : vector<4x256xf32> to vector<1x4x256xf32>
      tpu.vector_store %arg5[%c0_33, %c0_34, %c0_35], %61 {strides = array<i32>} : memref<1x4x256xf32, #tpu.memory_space<vmem>>, vector<1x4x256xf32>,
      %c0_36 = arith.constant 0 : index
      %c0_37 = arith.constant 0 : index
      %62 = vector.load %arg9[%c0_36, %c0_37] : memref<4x256xf32, #tpu.memory_space<vmem>>, vector<4x256xf32>
      %c0_38 = arith.constant 0 : index
      %c0_39 = arith.constant 0 : index
      %c0_40 = arith.constant 0 : index
      %63 = vector.load %arg6[%c0_38, %c0_39, %c0_40] : memref<1x4x256xf32, #tpu.memory_space<vmem>>, vector<1x4x256xf32>
      %64 = vector.shape_cast %63 : vector<1x4x256xf32> to vector<4x256xf32>
      %65 = vector.shape_cast %62 : vector<4x256xf32> to vector<1x4x256xf32>
      tpu.vector_store %arg6[%c0_38, %c0_39, %c0_40], %65 {strides = array<i32>} : memref<1x4x256xf32, #tpu.memory_space<vmem>>, vector<1x4x256xf32>,
    } else {
    }
    return
  }
  func.func @transform_0(%arg0: i32, %arg1: i32) -> (i32, i32, i32) {
    %c0_i32 = arith.constant 0 : i32
    %c0_i32_0 = arith.constant 0 : i32
    return %arg0, %c0_i32, %arg1 : i32, i32, i32
  }
  func.func @transform_1(%arg0: i32, %arg1: i32) -> (i32, i32, i32) {
    %c0_i32 = arith.constant 0 : i32
    %c0_i32_0 = arith.constant 0 : i32
    return %arg0, %c0_i32, %arg1 : i32, i32, i32
  }
  func.func @transform_2(%arg0: i32, %arg1: i32) -> (i32, i32, i32) {
    %c0_i32 = arith.constant 0 : i32
    %c0_i32_0 = arith.constant 0 : i32
    %c0_i32_1 = arith.constant 0 : i32
    return %arg0, %c0_i32, %c0_i32_0 : i32, i32, i32
  }
  func.func @transform_3(%arg0: i32, %arg1: i32) -> (i32, i32, i32) {
    %c0_i32 = arith.constant 0 : i32
    %c0_i32_0 = arith.constant 0 : i32
    %c0_i32_1 = arith.constant 0 : i32
    return %arg0, %c0_i32, %c0_i32_0 : i32, i32, i32
  }
  func.func @transform_4(%arg0: i32, %arg1: i32) -> (i32, i32, i32) {
    %c0_i32 = arith.constant 0 : i32
    %c0_i32_0 = arith.constant 0 : i32
    %c0_i32_1 = arith.constant 0 : i32
    return %arg0, %c0_i32, %c0_i32_0 : i32, i32, i32
  }
}

</mosaic_0001>

<bundles_post_ra>
// kernel: tpu_custom_call.1
= control target key start
LH: loop header
LB: loop body
LE: loop exit
PB: predicated region body
PF: predicated region fallthrough
CT: control target
= control target key end

     0   :  { %s1211_s0 = inlined_call_operand.hbm [shape: f32[2,4,256], index: 0, kind: input, shape index: {}]   ;;  %s1212_s1 = inlined_call_operand.vmem [shape: s8[2,1,256], index: 1, kind: input, shape index: {}]   ;;  %s1213_s2 = inlined_call_operand.hbm [shape: f32[2,4,256], index: 2, kind: output, shape index: {0}]   ;;  %s1214_s3 = inlined_call_operand.hbm [shape: f32[2,4,256], index: 3, kind: output, shape index: {1}]   ;;  %s1215_s4 = inlined_call_operand.hbm [shape: f32[2,4,256], index: 4, kind: output, shape index: {2}]  }
   0x1   :  { %1218 = sst [smem:[#allocation15_spill]] %s1211_s0 }
   0x2   :  { %10 = vsyncpa [#allocation6], 0 }
   0x3   :  { %12 = vsyncpa [#allocation6 + $0x1], 0 }
   0x4   :  { %13 = vsyncpa [#allocation7], 0 }
   0x5   :  { %15 = vsyncpa [#allocation7 + $0x1], 0 }
   0x6   :  { %16 = vsyncpa [#allocation10], 0 }
   0x7   :  { %18 = vsyncpa [#allocation10 + $0x1], 0  ;;  %s935_s15 = smov 0   ;;  %s937_s16 = smov 0  }
   0x8   :  { %s939_s17 = smov 0   ;;  %s941_s18 = smov 0  }
   0x9   :  { %s943_s19 = smov 0   ;;  %s945_s20 = smov 0  }
   0xa LB: > { %s966_s21 = sadd.s32 4294967295, %s903_s20   ;;  %s1217_s22 = sadd.s32 4294967294, %s903_s20   ;;  %s903_s20 = sphi %s945_s20, %s24_s20   ;;  %s899_s19 = sphi %s943_s19, %s1239_s19   ;;  %s895_s18 = sphi %s941_s18, %s1238_s18   ;;  %s891_s17 = sphi %s939_s17, %s1237_s17   ;;  %s887_s16 = sphi %s937_s16, %s1236_s16   ;;  %s883_s15 = sphi %s935_s15, %s1235_s15  }
   0xb   : > { %s36_s23 = sadd.s32 1, %s899_s19  ;;  %s45_s24 = sadd.s32 1, %s891_s17 }
   0xc   : > { %p38_p0 = scmp.ge.s32.totalorder %s36_s23, 2  ;;  %p52_p1 = scmp.ne.s32.totalorder %s891_s17, %s887_s16 }
   0xd   : > { %p53_p2 = scmp.eq.s32.totalorder %s903_s20, 0  ;;  %p58_p3 = scmp.ne.s32.totalorder %s887_s16, %s883_s15 }
   0xe   : > { %s1241_s23 = smov (%p38_p0, %s36_s23), 0  ;;  %p59_p5 = scmp.eq.s32.totalorder %s966_s21, 0 }
   0xf   : > { %p978_p4 = por %p53_p2, %p52_p1  ;;  %s40_s26 = ssub.s32 %s899_s19, %s1241_s23 }
  0x10   : > { %p110_p6 = scmp.eq.s32.totalorder %s966_s21, 1  ;;  %p43_p7 = scmp.eq.s32.totalorder %s40_s26, 0 }
  0x11   : > { %p986_p8 = por %p59_p5, %p58_p3  ;;  %p116_p10 = scmp.eq.s32.totalorder %s1217_s22, 1 }
  0x12   : > { %p990_p9 = por %p110_p6, %p52_p1  ;;  %p671_p13 = scmp.lt.s32.totalorder %s903_s20, 2 }
  0x13   : > { %s997_s29 = scalar_select %p43_p7, %s891_s17, %s45_s24  }
  0x14   : > { %s1221_s28 = scalar_select %p990_p9, 1, 0 }
  0x15   : > { %p999_p11 = por %p116_p10, %p58_p3  ;;  %s188_s5 = sand.u32 1, %s891_s17  }
  0x16   : > { %s623_s6 = sshll.u32 %s188_s5, 3  ;;  %s645_s7 = sshll.u32 %s899_s19, 7 }
  0x17   : > { %s1222_s30 = scalar_select %p999_p11, 1, 0 }
  0x18   : > { %s1223_s0 = sld [smem:[#allocation15_spill]]  ;;  %s192_s11 = scalar_lea.vmem [#allocation5], %s623_s6 }
  0x19   : > { %s202_s12 = sshll.u32 %s192_s11, 4  ;;  %p1016_p0 = pnand %p671_p13, %p978_p4  ;;  %s1012_s12 = int_to_ptr.vmem [resolvable:$true] %s202_s12 }
  0x1a   : > { %s189_s14 = scalar_lea.sflag [#allocation6], %s188_s5 }
  0x1b   : > { %p733_p5 = pneg %p1016_p0 }
  0x1e   : > { %s1010_s10 = scalar_lea.hbm %s1223_s0, %s645_s7  ;;  %s736_s25 = scalar_lea.hbm %s1223_s0, 256 }
  0x1f   : > { %s731_s24 = scalar_lea.hbm %s1010_s10, 128  ;;  %p737_p4 = scmp.lt.u32.totalorder %s1010_s10, %s1223_s0 }
  0x20   : > { %p732_p3 = scmp.ne.s32.totalorder %s1010_s10, %s731_s24  ;;  %p738_p10 = scmp.lt.u32.totalorder %s736_s25, %s731_s24 }
  0x21   : > { %p740_p12 = scmp.lt.u32.totalorder %s731_s24, %s1010_s10 }
  0x22   : > { %p734_p6 = pnand %p733_p5, %p732_p3  ;;  %p739_p13 = por %p738_p10, %p737_p4 }
  0x24   : > { %p735_p7 = pneg %p734_p6  ;;  %p741_p1 = por %p740_p12, %p739_p13 }
  0x26   : > { %p742_p2 = pnand %p741_p1, %p735_p7 }
  0x28   : > { %745 = shalt.err (!%p742_p2)
}
  0x29   : > { %s746_s5 = scalar_lea.vmem %s1012_s12, 128  ;;  %s905_s9 = smov [#allocation5]  }
  0x2a   : > { %p747_p3 = scmp.ne.s32.totalorder %s1012_s12, %s746_s5  ;;  %s751_s11 = sshll.u32 %s905_s9, 4  ;;  %s752_s11 = int_to_ptr.vmem [resolvable:$false] %s751_s11 }
  0x2b   : > { %s753_s26 = scalar_lea.vmem %s752_s11, 256  ;;  %p754_p9 = scmp.lt.s32.totalorder %s1012_s12, %s752_s11 }
  0x2c   : > { %p749_p6 = pnand %p747_p3, %p733_p5  ;;  %p755_p4 = scmp.lt.s32.totalorder %s753_s26, %s746_s5 }
  0x2e   : > { %p750_p11 = pneg %p749_p6  ;;  %p756_p10 = por %p755_p4, %p754_p9 }
  0x30   : > { %p757_p12 = pnand %p756_p10, %p750_p11 }
  0x32   : > { %760 = shalt.err (!%p757_p12)
}
  0x33   : > { %660 = dma.hbm_to_vmem [thread:$0]  (!%p1016_p0), %s1010_s10, 128, %s1012_s12, %s189_s14  }
  0x34   : > { %p1225_p1 = scmp.lt.s32.totalorder %s903_s20, 3  ;;  %p1226_p2 = scmp.ge.s32.totalorder %s903_s20, 1 }
  0x36   : > { %p220_p5 = pnand %p1226_p2, %p1225_p1 }
  0x37   : > { %s1052_s24 = sand.u32 (!%p220_p5), 1, %s887_s16  }
  0x38   : > { %223 = sbr.rel (%p220_p5) target bundleno = 183 (0xb7), region = 28  ;;  %s1055_s6 = sshll.u32 (!%p220_p5), %s1052_s24, 3 }
  0x39   : > { %s226_s25 = scalar_lea.sflag (!%p220_p5), [#allocation6], %s1052_s24  ;;  %s229_s13 = scalar_lea.vmem (!%p220_p5), [#allocation5], %s1055_s6 }
  0x3f   : > { %870 = dma.done.wait (%p986_p8), %s226_s25, 128  }
  0x40   : > { %872 = vsyncadd (%p986_p8), %s226_s25, 4294967168  ;;  %v289_v0 = vlaneseq  ;;  %p274_p9 = scmp.lt.s32.totalorder %s895_s18, 1  ;;  %vm312_vm0 = vcmask 1043456   ;;  %v295_v4 = vld [vmem:[%s229_s13] sm:$0xff]  ;;  %v906_v23 = vmov 0.0   ;;  %s271_s27 = scalar_lea.vmem [#allocation11], %s1055_s6 }
  0x41   : > { %v308_v6 = vcombine.high %v295_v4, %v295_v4  ;;  %v313_v7 = vsel %vm312_vm0, %v295_v4, -inf  ;;  %s264_s5 = scalar_lea.vmem [#allocation9], %s1055_s6  ;;  %s257_s11 = scalar_lea.vmem [#allocation8], %s1055_s6 }
  0x42   : > { %v290_v1 = vshrl.u32 %v289_v0, 7  ;;  %s275_s10 = scalar_select %p274_p9, %s895_s18, 1  ;;  %v314_v9 = vrot.slane %v313_v7, 4 }
  0x43   : > { %v320_v10 = vsel %vm312_vm0, %v308_v6, -inf  ;;  %s448_s9 = sshll.u32 %s264_s5, 4  ;;  %s434_s26 = sshll.u32 %s257_s11, 4  ;;  %s1091_s9 = int_to_ptr.vmem [resolvable:$true] %s448_s9  ;;  %s1095_s26 = int_to_ptr.vmem [resolvable:$true] %s434_s26 }
  0x44   : > { %s631_s12 = sshll.u32 %s275_s10, 1  ;;  %v353_v2 = vsub.s32 0, %v290_v1  ;;  %v357_v3 = vsub.s32 4, %v290_v1  ;;  %v315_v13 = vmax.f32 %v313_v7, %v314_v9  ;;  %v321_v14 = vrot.slane %v320_v10, 4  ;;  %s414_s25 = sand.u32 1, %s966_s21  }
  0x45   : > { %s280_s8 = scalar_lea.vmem %s1212_s1, %s631_s12  ;;  %s646_s13 = sshll.u32 %s895_s18, 7 }
  0x46   : > { %v296_v5 = vld [vmem:[%s280_s8] sm:$0x3]  ;;  %v316_v17 = vrot.slane %v315_v13, 2  ;;  %v322_v18 = vmax.f32 %v320_v10, %v321_v14  ;;  %s462_s10 = sshll.u32 %s271_s27, 4  ;;  %s1104_s18 = scalar_lea.hbm %s1214_s3, %s646_s13  ;;  %s1111_s10 = int_to_ptr.vmem [resolvable:$true] %s462_s10 }
  0x47   : > { %v297_v8 = vunpack.c.0.s8 %v296_v5  ;;  %s1109_s8 = scalar_lea.hbm %s1213_s2, %s646_s13  ;;  %s1116_s22 = scalar_lea.hbm %s1215_s4, %s646_s13 }
  0x48   : > { %v317_v21 = vmax.f32 %v315_v13, %v316_v17  ;;  %v323_v22 = vrot.slane %v322_v18, 2  ;;  %s1118_s0 = scalar_lea.sflag [#allocation10], %s414_s25  ;;  %s761_s12 = scalar_lea.vmem %s1091_s9, 128 }
  0x49   : > { %v354_v11 = vrot.slane %v297_v8, %v353_v2  ;;  %v358_v12 = vrot.slane %v297_v8, %v357_v3  ;;  %p762_p8 = scmp.ne.s32.totalorder %s1091_s9, %s761_s12  ;;  %p1231_p11 = scmp.ne.s32.totalorder %s1221_s28, 0 }
  0x4a   : > { %v318_v27 = vrot.slane %v317_v21, 1  ;;  %v324_v28 = vmax.f32 %v322_v18, %v323_v22  ;;  %s907_s21 = smov [#allocation9]  }
  0x4b   : > { %v362_v15 = vrot.slane %v354_v11, %v353_v2  ;;  %v366_v16 = vrot.slane %v358_v12, %v353_v2  ;;  %p763_p0 = pnand %p762_p8, %p1231_p11  ;;  %s765_s14 = sshll.u32 %s907_s21, 4  ;;  %s766_s14 = int_to_ptr.vmem [resolvable:$false] %s765_s14 }
  0x4c   : > { %v319_v29 = vmax.f32 %v317_v21, %v318_v27  ;;  %v325_v30 = vrot.slane %v324_v28, 1  ;;  %s767_s7 = scalar_lea.vmem %s766_s14, 256  ;;  %p768_p13 = scmp.lt.s32.totalorder %s1091_s9, %s766_s14 }
  0x4d   : > { %vm1070_vm1 = vcmp.eq.s32.totalorder %v362_v15, %v290_v1  ;;  %vm1074_vm2 = vcmp.eq.s32.totalorder %v366_v16, %v290_v1  ;;  %p764_p7 = pneg %p763_p0  ;;  %p769_p3 = scmp.lt.s32.totalorder %s767_s7, %s761_s12 }
  0x4e   : > { %v632_v24 = vsel %vm1070_vm1, 1.0, %v906_v23  ;;  %v633_v25 = vsel %vm1074_vm2, 1.0, %v906_v23  ;;  %v326_v31 = vmax.f32 %v324_v28, %v325_v30  ;;  %v327_v32 = vsub.f32 %v295_v4, %v319_v29 }
  0x4f   : > { %v396_v26 = vcombine.low %v632_v24, %v633_v25  ;;  %p770_p6 = por %p769_p3, %p768_p13 }
  0x50   : > { %v328_v33 = vsub.f32 %v308_v6, %v326_v31  ;;  %v329_v34 = vmul.f32 1.442695, %v327_v32 }
  0x51   : > { %408 = vst [vmem:[%s271_s27] sm:$0xff] %v396_v26  ;;  %p771_p4 = pnand %p770_p6, %p764_p7 }
  0x52   : > { %723 = vpow2.f32 %v329_v34  ;;  %v331_v35 = vmul.f32 1.442695, %v328_v33 }
  0x54   : > { %725 = vpow2.f32 %v331_v35 }
  0x5c   : > { %v724_v36 = vpop.eup %723 }
  0x5d   : > { %v333_v37 = vsel %vm312_vm0, %v724_v36, 0.0 }
  0x5e   : > { %v726_v38 = vpop.eup %725  ;;  %v334_v39 = vrot.slane %v333_v37, 4 }
  0x5f   : > { %v340_v40 = vsel %vm312_vm0, %v726_v38, 0.0 }
  0x60   : > { %v335_v41 = vadd.f32 %v334_v39, %v333_v37  ;;  %v341_v42 = vrot.slane %v340_v40, 4 }
  0x62   : > { %v336_v43 = vrot.slane %v335_v41, 2  ;;  %v342_v44 = vadd.f32 %v341_v42, %v340_v40 }
  0x64   : > { %v337_v45 = vadd.f32 %v336_v43, %v335_v41  ;;  %v343_v46 = vrot.slane %v342_v44, 2 }
  0x66   : > { %v338_v47 = vrot.slane %v337_v45, 1  ;;  %v344_v48 = vadd.f32 %v343_v46, %v342_v44 }
  0x68   : > { %v339_v49 = vadd.f32 %v338_v47, %v337_v45  ;;  %v345_v50 = vrot.slane %v344_v48, 1 }
  0x6a   : > { %v346_v51 = vadd.f32 %v345_v50, %v344_v48  ;;  %727 = vrcp.f32 %v339_v49 }
  0x6c   : > { %729 = vrcp.f32 %v346_v51 }
  0x74   : > { %v728_v52 = vpop.eup %727 }
  0x75   : > { %v349_v53 = vmul.f32 %v728_v52, %v724_v36 }
  0x76   : > { %v730_v54 = vpop.eup %729 }
  0x77   : > { %v350_v55 = vmul.f32 %v730_v54, %v726_v38  ;;  %v372_v56 = vsel %vm1070_vm1, %v349_v53, 0.0 }
  0x79   : > { %v385_v57 = vcombine.low %v349_v53, %v350_v55  ;;  %v373_v58 = vsel %vm1074_vm2, %v350_v55, 0.0 }
  0x7a   : > { %v376_v59 = vcombine.low %v372_v56, %v373_v58 }
  0x7b   : > { %406 = vst [vmem:[%s264_s5] sm:$0xff] %v385_v57 }
  0x7c   : > { %404 = vst [vmem:[%s257_s11] sm:$0xff] %v376_v59 }
  0x7d   : > { %774 = shalt.err (!%p771_p4)
}
  0x7e   : > { %s775_s5 = scalar_lea.hbm %s1104_s18, 128  ;;  %s779_s13 = scalar_lea.hbm %s1214_s3, 256 }
  0x7f   : > { %p776_p10 = scmp.ne.s32.totalorder %s1104_s18, %s775_s5  ;;  %p780_p2 = scmp.lt.u32.totalorder %s1104_s18, %s1214_s3 }
  0x80   : > { %p781_p5 = scmp.lt.u32.totalorder %s779_s13, %s775_s5  ;;  %p783_p8 = scmp.lt.u32.totalorder %s775_s5, %s1104_s18 }
  0x81   : > { %p777_p12 = pnand %p776_p10, %p1231_p11 }
  0x82   : > { %p782_p9 = por %p781_p5, %p780_p2 }
  0x83   : > { %p778_p1 = pneg %p777_p12 }
  0x84   : > { %p784_p0 = por %p783_p8, %p782_p9 }
  0x86   : > { %p785_p7 = pnand %p784_p0, %p778_p1 }
  0x88   : > { %788 = shalt.err (!%p785_p7)
}
  0x89   : > { %652 = dma.vmem_to_hbm [thread:$0]  (%p1231_p11), %s1091_s9, 128, %s1104_s18, %s1118_s0  }
  0x8a   : > { %s410_s12 = scalar_lea.sflag [#allocation7], %s1052_s24  ;;  %s789_s21 = scalar_lea.vmem %s1095_s26, 128 }
  0x8b   : > { %p790_p13 = scmp.ne.s32.totalorder %s1095_s26, %s789_s21  ;;  %s908_s14 = smov [#allocation8]  }
  0x8c   : > { %s793_s7 = sshll.u32 %s908_s14, 4  ;;  %s794_s7 = int_to_ptr.vmem [resolvable:$false] %s793_s7 }
  0x8d   : > { %p791_p3 = pnand %p790_p13, %p1231_p11  ;;  %s795_s5 = scalar_lea.vmem %s794_s7, 256 }
  0x8e   : > { %p796_p4 = scmp.lt.s32.totalorder %s1095_s26, %s794_s7  ;;  %p797_p10 = scmp.lt.s32.totalorder %s795_s5, %s789_s21 }
  0x8f   : > { %p792_p6 = pneg %p791_p3 }
  0x90   : > { %p798_p12 = por %p797_p10, %p796_p4 }
  0x92   : > { %p799_p1 = pnand %p798_p12, %p792_p6 }
  0x94   : > { %802 = shalt.err (!%p799_p1)
}
  0x95   : > { %s803_s24 = scalar_lea.hbm %s1109_s8, 128  ;;  %s807_s11 = scalar_lea.hbm %s1213_s2, 256 }
  0x96   : > { %p804_p2 = scmp.ne.s32.totalorder %s1109_s8, %s803_s24  ;;  %p808_p8 = scmp.lt.u32.totalorder %s1109_s8, %s1213_s2 }
  0x97   : > { %p809_p0 = scmp.lt.u32.totalorder %s807_s11, %s803_s24  ;;  %p811_p13 = scmp.lt.u32.totalorder %s803_s24, %s1109_s8 }
  0x98   : > { %p805_p5 = pnand %p804_p2, %p1231_p11 }
  0x99   : > { %p810_p7 = por %p809_p0, %p808_p8 }
  0x9a   : > { %p806_p9 = pneg %p805_p5 }
  0x9b   : > { %p812_p3 = por %p811_p13, %p810_p7 }
  0x9d   : > { %p813_p6 = pnand %p812_p3, %p806_p9 }
  0x9f   : > { %816 = shalt.err (!%p813_p6)
}
  0xa0   : > { %651 = dma.vmem_to_hbm [thread:$0]  (%p1231_p11), %s1095_s26, 128, %s1109_s8, %s410_s12  }
  0xa1   : > { %s817_s6 = scalar_lea.vmem %s1111_s10, 128  ;;  %s909_s27 = smov [#allocation11]  }
  0xa2   : > { %p818_p4 = scmp.ne.s32.totalorder %s1111_s10, %s817_s6  ;;  %s821_s21 = sshll.u32 %s909_s27, 4  ;;  %s822_s21 = int_to_ptr.vmem [resolvable:$false] %s821_s21 }
  0xa3   : > { %s823_s14 = scalar_lea.vmem %s822_s21, 256  ;;  %p824_p1 = scmp.lt.s32.totalorder %s1111_s10, %s822_s21 }
  0xa4   : > { %p819_p10 = pnand %p818_p4, %p1231_p11  ;;  %p825_p2 = scmp.lt.s32.totalorder %s823_s14, %s817_s6 }
  0xa6   : > { %p820_p12 = pneg %p819_p10  ;;  %p826_p5 = por %p825_p2, %p824_p1 }
  0xa8   : > { %p827_p9 = pnand %p826_p5, %p820_p12 }
  0xaa   : > { %830 = shalt.err (!%p827_p9)
}
  0xab   : > { %s831_s26 = scalar_lea.hbm %s1116_s22, 128  ;;  %s835_s7 = scalar_lea.hbm %s1215_s4, 256 }
  0xac   : > { %p832_p8 = scmp.ne.s32.totalorder %s1116_s22, %s831_s26  ;;  %p836_p13 = scmp.lt.u32.totalorder %s1116_s22, %s1215_s4 }
  0xad   : > { %p837_p3 = scmp.lt.u32.totalorder %s835_s7, %s831_s26  ;;  %p839_p4 = scmp.lt.u32.totalorder %s831_s26, %s1116_s22 }
  0xae   : > { %p833_p0 = pnand %p832_p8, %p1231_p11 }
  0xaf   : > { %p838_p6 = por %p837_p3, %p836_p13 }
  0xb0   : > { %p834_p7 = pneg %p833_p0 }
  0xb1   : > { %p840_p10 = por %p839_p4, %p838_p6 }
  0xb3   : > { %p841_p12 = pnand %p840_p10, %p834_p7 }
  0xb5   : > { %844 = shalt.err (!%p841_p12)
}
  0xb6   : > { %653 = dma.vmem_to_hbm [thread:$0]  (%p1231_p11), %s1111_s10, 128, %s1116_s22, %s1118_s0  }
  0xb7 PF: > { %s474_s9 = sand.u32 1, %s883_s15   ;;  %p1232_p1 = scmp.ne.s32.totalorder %s1222_s30, 0 }
  0xb8   : > { %p1233_p2 = scmp.ge.s32.totalorder %s903_s20, 2  ;;  %s475_s18 = scalar_lea.sflag [#allocation7], %s474_s9 }
  0xba   : > { %p662_p5 = pnand %p1233_p2, %p1232_p1 }
  0xbc   : > { %874 = dma.done.wait (!%p662_p5), %s475_s18, 128  }
  0xbd   : > { %876 = vsyncadd (!%p662_p5), %s475_s18, 4294967168  ;;  %s1234_s11 = sadd.s32 4294967294, %s903_s20  }
  0xbe   : > { %s483_s25 = sand.u32 1, %s1234_s11  }
  0xbf   : > { %s484_s13 = scalar_lea.sflag [#allocation10], %s483_s25 }
  0xc0   : > { %878 = dma.done.wait (!%p662_p5), %s484_s13, 256  }
  0xc1   : > { %880 = vsyncadd (!%p662_p5), %s484_s13, 4294967040  ;;  %s24_s20 = sadd.s32 1, %s903_s20   ;;  %s1235_s15 = smov %s887_s16 }
  0xc2   : > { %p21_p11 = scmp.ge.s32.totalorder %s24_s20, 4   ;;  %s1236_s16 = smov %s891_s17 }
  0xc3   : > { %s1237_s17 = smov %s997_s29  ;;  %s1238_s18 = smov %s899_s19 }
  0xc4   : > { %s1239_s19 = smov %s1241_s23  ;;  %23 = sbr.rel (!%p21_p11) target bundleno = 10 (0xa), region = 116 }
  0xcb   :  { %498 = vsyncpa [#allocation6], 1 }
  0xcc   :  { %500 = vsyncpa [#allocation6 + $0x1], 1 }
  0xcd   :  { %501 = vsyncpa [#allocation7], 1 }
  0xce   :  { %503 = vsyncpa [#allocation7 + $0x1], 1 }
  0xcf   :  { %504 = vsyncpa [#allocation10], 1 }
  0xd0   :  { %506 = vsyncpa [#allocation10 + $0x1], 1 }

</bundles_post_ra>
